<compile_context>
chip_gen: v6e
topology: v6e:2x2x1
jax: 0.10.0
libtpu: 0.0.40
codegen_flags: <defaults>
</compile_context>

<pallas_src>
import functools
import math

import jax
import jax.numpy as jnp
from jax.experimental import pallas as pl
from jax.experimental.pallas import tpu as pltpu

BN_EPS = 1e-5
LANE = 128
K_SINGLE_MAX = 4608          # largest K handled as one un-tiled reduction block
VMEM_LIMIT = 48 * 1024 * 1024


def _round_up(x, m):
    return ((x + m - 1) // m) * m


def _pick_tile(dim, cap=512):
    """Largest tile <= cap dividing `dim` (dim is a multiple of 128)."""
    if dim <= cap:
        return dim
    for t in (512, 384, 256, 128):
        if dim % t == 0:
            return t
    return 128


def _pick_k_tile(kp):
    for t in (2304, 2048, 1536, 1152, 1024, 768, 512, 384, 256, 128):
        if kp % t == 0:
            return t
    return 128


# ----------------------------------------------------------------------------
# Pallas kernels:  out = act(scale * (A @ W) + shift [+ residual])
# ----------------------------------------------------------------------------
def _apply_epilogue(y, scale, shift, res, act):
    y = y * scale + shift
    if res is not None:
        y = y + res.astype(jnp.float32)
    if act == "relu":
        y = jnp.maximum(y, 0.0)
    elif act == "sigmoid":
        y = 1.0 / (1.0 + jnp.exp(-y))
    return y


def _gemm_kernel_single(*refs, act, has_res):
    # grid = (M_blocks, N_blocks); whole K lives in one block -> no scratch.
    if has_res:
        a_ref, w_ref, scale_ref, shift_ref, res_ref, o_ref = refs
        res = res_ref[...]
    else:
        a_ref, w_ref, scale_ref, shift_ref, o_ref = refs
        res = None
    y = jnp.dot(a_ref[...], w_ref[...], preferred_element_type=jnp.float32)
    y = _apply_epilogue(y, scale_ref[...], shift_ref[...], res, act)
    o_ref[...] = y.astype(o_ref.dtype)


def _gemm_kernel_multik(*refs, act, has_res):
    # grid = (M_blocks, N_blocks, K_blocks); f32 accumulator scratch.
    if has_res:
        a_ref, w_ref, scale_ref, shift_ref, res_ref, o_ref, acc_ref = refs
    else:
        a_ref, w_ref, scale_ref, shift_ref, o_ref, acc_ref = refs
        res_ref = None
    k = pl.program_id(2)

    @pl.when(k == 0)
    def _():
        acc_ref[...] = jnp.zeros_like(acc_ref)

    acc_ref[...] += jnp.dot(a_ref[...], w_ref[...],
                            preferred_element_type=jnp.float32)

    @pl.when(k == pl.num_programs(2) - 1)
    def _():
        res = res_ref[...] if res_ref is not None else None
        y = _apply_epilogue(acc_ref[...], scale_ref[...], shift_ref[...], res, act)
        o_ref[...] = y.astype(o_ref.dtype)


@functools.partial(jax.jit, static_argnames=("act", "has_res"))
def _pallas_gemm(a, w, scale, shift, res, act, has_res):
    M, K = a.shape
    _, N = w.shape
    Mp, Kp, Np = _round_up(M, LANE), _round_up(K, LANE), _round_up(N, LANE)
    TM, TN = _pick_tile(Mp), _pick_tile(Np)

    # bf16 MXU operands, f32 accumulation.
    a = a.astype(jnp.bfloat16)
    w = w.astype(jnp.bfloat16)
    if (Mp, Kp) != (M, K):
        a = jnp.pad(a, ((0, Mp - M), (0, Kp - K)))
    if (Kp, Np) != (K, N):
        w = jnp.pad(w, ((0, Kp - K), (0, Np - N)))
    scale = scale.reshape(1, -1).astype(jnp.float32)
    shift = shift.reshape(1, -1).astype(jnp.float32)
    if Np != N:
        scale = jnp.pad(scale, ((0, 0), (0, Np - N)))
        shift = jnp.pad(shift, ((0, 0), (0, Np - N)))

    inputs = [a, w, scale, shift]
    bytes_accessed = (Mp * Kp + Kp * Np + Mp * Np) * 2 + Np * 8
    if has_res:
        res = res.astype(jnp.bfloat16)
        if res.shape != (Mp, Np):
            res = jnp.pad(res, ((0, Mp - res.shape[0]), (0, Np - res.shape[1])))
        inputs.append(res)
        bytes_accessed += Mp * Np * 2

    cost = pl.CostEstimate(
        flops=2 * Mp * Np * Kp,
        transcendentals=Mp * Np if act == "sigmoid" else 0,
        bytes_accessed=bytes_accessed)

    if Kp <= K_SINGLE_MAX:
        grid = (Mp // TM, Np // TN)
        in_specs = [
            pl.BlockSpec((TM, Kp), lambda i, j: (i, 0)),
            pl.BlockSpec((Kp, TN), lambda i, j: (0, j)),
            pl.BlockSpec((1, TN), lambda i, j: (0, j)),
            pl.BlockSpec((1, TN), lambda i, j: (0, j)),
        ]
        if has_res:
            in_specs.append(pl.BlockSpec((TM, TN), lambda i, j: (i, j)))
        out_specs = pl.BlockSpec((TM, TN), lambda i, j: (i, j))
        kernel = functools.partial(_gemm_kernel_single, act=act, has_res=has_res)
        scratch_shapes = []
        dim_sem = ("parallel", "parallel")
    else:
        TK = _pick_k_tile(Kp)
        grid = (Mp // TM, Np // TN, Kp // TK)
        in_specs = [
            pl.BlockSpec((TM, TK), lambda i, j, k: (i, k)),
            pl.BlockSpec((TK, TN), lambda i, j, k: (k, j)),
            pl.BlockSpec((1, TN), lambda i, j, k: (0, j)),
            pl.BlockSpec((1, TN), lambda i, j, k: (0, j)),
        ]
        if has_res:
            in_specs.append(pl.BlockSpec((TM, TN), lambda i, j, k: (i, j)))
        out_specs = pl.BlockSpec((TM, TN), lambda i, j, k: (i, j))
        kernel = functools.partial(_gemm_kernel_multik, act=act, has_res=has_res)
        scratch_shapes = [pltpu.VMEM((TM, TN), jnp.float32)]
        dim_sem = ("parallel", "parallel", "arbitrary")

    out = pl.pallas_call(
        kernel,
        out_shape=jax.ShapeDtypeStruct((Mp, Np), jnp.bfloat16),
        grid=grid,
        in_specs=in_specs,
        out_specs=out_specs,
        scratch_shapes=scratch_shapes,
        compiler_params=pltpu.CompilerParams(
            dimension_semantics=dim_sem,
            vmem_limit_bytes=VMEM_LIMIT),
        cost_estimate=cost,
    )(*inputs)
    return out[:M, :N]


def pallas_gemm(a, w, scale, shift, residual=None, act="none"):
    if residual is None:
        dummy = jnp.zeros((1, 1), jnp.bfloat16)
        return _pallas_gemm(a, w, scale, shift, dummy, act, False)
    return _pallas_gemm(a, w, scale, shift, residual, act, True)


# ----------------------------------------------------------------------------
# Conv2d / Conv2dTranspose blocks (Wav2Lip-style: conv + BatchNorm(eval) +
# [residual] + ReLU), NHWC activations, weights in PyTorch layouts.
# ----------------------------------------------------------------------------
def _pair(v):
    return (v, v) if isinstance(v, int) else tuple(v)


def _im2col_nhwc(x, kh, kw, stride, padding):
    # x: (N, H, W, C)  ->  A: (N*Hout*Wout, kh*kw*C)
    # TODO(synk): a direct Pallas shift-and-accumulate conv kernel would avoid
    # materializing the kh*kw-expanded patch matrix in HBM.
    sh, sw = stride
    ph, pw = padding
    N, H, W, C = x.shape
    Hout = (H + 2 * ph - kh) // sh + 1
    Wout = (W + 2 * pw - kw) // sw + 1
    if kh == 1 and kw == 1 and (sh, sw) == (1, 1) and (ph, pw) == (0, 0):
        return x.reshape(N * H * W, C), (N, Hout, Wout)
    xp = jnp.pad(x, ((0, 0), (ph, ph), (pw, pw), (0, 0)))
    cols = []
    for ki in range(kh):
        for kj in range(kw):
            cols.append(xp[:, ki:ki + sh * Hout:sh, kj:kj + sw * Wout:sw, :])
    a = jnp.concatenate(cols, axis=-1)            # (N, Hout, Wout, kh*kw*C)
    return a.reshape(N * Hout * Wout, kh * kw * C), (N, Hout, Wout)


@functools.partial(jax.jit,
                   static_argnames=("stride", "padding", "bn", "residual", "act"))
def conv2d_block(x, w, b, stride, padding, *, bn=True, residual=False,
                 act="relu"):
    # x: NHWC.  w: (Cout, Cin, kh, kw) — PyTorch Conv2d layout.
    Cout, Cin, kh, kw = w.shape
    stride, padding = _pair(stride), _pair(padding)
    a, (N, Hout, Wout) = _im2col_nhwc(x, kh, kw, stride, padding)
    wm = jnp.transpose(w, (2, 3, 1, 0)).reshape(kh * kw * Cin, Cout)
    if bn:
        # eval-mode BatchNorm with default-initialized stats
        # (gamma=1, beta=0, mean=0, var=1) folded into scale/shift.
        scale = jnp.full((Cout,), 1.0 / math.sqrt(1.0 + BN_EPS), jnp.float32)
        shift = scale * b.astype(jnp.float32)
    else:
        scale = jnp.ones((Cout,), jnp.float32)
        shift = b.astype(jnp.float32)
    res = None
    if residual:
        assert Cin == Cout and stride == (1, 1) and x.shape[1:3] == (Hout, Wout)
        res = x.reshape(N * Hout * Wout, Cout)
    out = pallas_gemm(a, wm, scale, shift, residual=res, act=act)
    return out.reshape(N, Hout, Wout, Cout)


def conv_transpose2d_block(x, w, b, stride, padding, output_padding,
                           act="relu"):
    # x: NHWC.  w: (Cin, Cout, kh, kw) — PyTorch ConvTranspose2d layout.
    # TODO(synk): a phase-decomposed (sub-pixel) transposed conv would avoid
    # multiplying against the inserted zeros for the stride-2 decoder layers.
    Cin, Cout, kh, kw = w.shape
    sh, sw = _pair(stride)
    ph, pw = _pair(padding)
    oph, opw = _pair(output_padding)
    N, H, W, C = x.shape
    if (sh, sw) == (1, 1):
        xd = x
    else:
        Hd, Wd = (H - 1) * sh + 1, (W - 1) * sw + 1
        xd = jnp.zeros((N, Hd, Wd, C), x.dtype).at[:, ::sh, ::sw, :].set(x)
    pt, pb = kh - 1 - ph, kh - 1 - ph + oph
    pleft, pright = kw - 1 - pw, kw - 1 - pw + opw
    xp = jnp.pad(xd, ((0, 0), (pt, pb), (pleft, pright), (0, 0)))
    w_conv = jnp.flip(w, axis=(2, 3)).transpose(1, 0, 2, 3)   # (Cout,Cin,kh,kw)
    return conv2d_block(xp, w_conv, b, (1, 1), (0, 0), bn=True,
                        residual=False, act=act)


# ----------------------------------------------------------------------------
# Architecture specs (mirrors FlowModel.__init__ exactly for the 2D branches)
# spec: (cin, cout, kernel, stride, padding, residual)
# ----------------------------------------------------------------------------
FACE_ENCODER = [
    [(6, 16, 7, 1, 3, False)],
    [(16, 32, 3, 2, 1, False), (32, 32, 3, 1, 1, True), (32, 32, 3, 1, 1, True)],
    [(32, 64, 3, 2, 1, False)] + [(64, 64, 3, 1, 1, True)] * 3,
    [(64, 128, 3, 2, 1, False)] + [(128, 128, 3, 1, 1, True)] * 2,
    [(128, 256, 3, 2, 1, False)] + [(256, 256, 3, 1, 1, True)] * 2,
    [(256, 512, 3, 2, 1, False), (512, 512, 3, 1, 1, True)],
    [(512, 512, 3, 1, 0, False), (512, 512, 1, 1, 0, False)],
]

AUDIO_ENCODER = [
    (1, 32, 3, 1, 1, False), (32, 32, 3, 1, 1, True), (32, 32, 3, 1, 1, True),
    (32, 64, 3, (3, 1), 1, False), (64, 64, 3, 1, 1, True), (64, 64, 3, 1, 1, True),
    (64, 128, 3, 3, 1, False), (128, 128, 3, 1, 1, True), (128, 128, 3, 1, 1, True),
    (128, 256, 3, (3, 2), 1, False), (256, 256, 3, 1, 1, True),
    (256, 512, 3, 1, 0, False), (512, 512, 1, 1, 0, False), (512, 512, 1, 1, 0, False),
]

# (transpose spec: (cin, cout, k, stride, pad, output_pad), residual conv specs)
FACE_DECODER = [
    ((1536, 512, 3, 1, 0, 0), [(512, 512, 3, 1, 1, True)]),
    ((1024, 512, 3, 2, 1, 1), [(512, 512, 3, 1, 1, True)] * 2),
    ((768, 384, 3, 2, 1, 1), [(384, 384, 3, 1, 1, True)] * 2),
    ((512, 256, 3, 2, 1, 1), [(256, 256, 3, 1, 1, True)] * 2),
    ((320, 128, 3, 2, 1, 1), [(128, 128, 3, 1, 1, True)] * 2),
    ((160, 64, 3, 2, 1, 1), [(64, 64, 3, 1, 1, True)] * 2),
]

OUTPUT_BLOCK_CONV = (80, 32, 3, 1, 1, False)   # Conv2d (+BN+ReLU)
OUTPUT_FINAL_CONV = (32, 3, 1, 1, 0)           # plain nn.Conv2d, then Sigmoid


# ----------------------------------------------------------------------------
# Deterministic parameter initialization
# ----------------------------------------------------------------------------
def init_params(key):
    counter = [0]

    def _nxt():
        counter[0] += 1
        return jax.random.fold_in(key, counter[0])

    def conv_p(cin, cout, k):
        kh, kw = _pair(k)
        kk = _nxt()
        w = jax.random.normal(kk, (cout, cin, kh, kw), jnp.float32)
        w = w / math.sqrt(cin * kh * kw)
        b = jax.random.normal(jax.random.fold_in(kk, 1), (cout,), jnp.float32) * 0.01
        return w, b

    def convt_p(cin, cout, k):
        kh, kw = _pair(k)
        kk = _nxt()
        w = jax.random.normal(kk, (cin, cout, kh, kw), jnp.float32)
        w = w / math.sqrt(cin * kh * kw)
        b = jax.random.normal(jax.random.fold_in(kk, 1), (cout,), jnp.float32) * 0.01
        return w, b

    params = {
        "face_enc": [[conv_p(s[0], s[1], s[2]) for s in blk] for blk in FACE_ENCODER],
        "audio_enc": [conv_p(s[0], s[1], s[2]) for s in AUDIO_ENCODER],
        "face_dec": [
            {"up": convt_p(t[0], t[1], t[2]),
             "convs": [conv_p(s[0], s[1], s[2]) for s in convs]}
            for (t, convs) in FACE_DECODER
        ],
        "out_conv": conv_p(*OUTPUT_BLOCK_CONV[:2], OUTPUT_BLOCK_CONV[2]),
        "out_final": conv_p(OUTPUT_FINAL_CONV[0], OUTPUT_FINAL_CONV[1],
                            OUTPUT_FINAL_CONV[2]),
        # stand-in projection for the I3D mouth feature extractor (2 -> 1024)
        "mouth_proj": (
            jax.random.normal(jax.random.fold_in(key, 10_001), (2, 1024),
                              jnp.float32) / math.sqrt(2.0),
            jax.random.normal(jax.random.fold_in(key, 10_002), (1024,),
                              jnp.float32) * 0.01,
        ),
    }
    return params


def _run_conv_seq(params_list, specs, x):
    for (w, b), (cin, cout, k, stride, pad, residual) in zip(params_list, specs):
        x = conv2d_block(x, w, b, _pair(stride), _pair(pad), bn=True,
                         residual=residual, act="relu")
    return x


def extract_mouth_features(params, mouths):
    # TODO(synk): the InceptionI3d trunk_flow (flow_imagenet.pt checkpoint) has
    # no clean in-script equivalent; stand-in = global avg-pool over (T,H,W)
    # followed by a Pallas GEMM projection 2 -> 1024 (I3D feature width).
    Bm = mouths.shape[0]
    pooled = jnp.mean(mouths, axis=(2, 3, 4))          # (Bm, 2)
    w, b = params["mouth_proj"]
    out = pallas_gemm(pooled, w, jnp.ones((1024,), jnp.float32), b, act="none")
    return out                                          # (Bm, 1024)


# ----------------------------------------------------------------------------
# FlowModel.forward
# ----------------------------------------------------------------------------
def flow_model_forward(params, audio_sequences, face_sequences, mouths):
    B = audio_sequences.shape[0]
    input_dim_size = face_sequences.ndim

    if input_dim_size > 4:
        audio = jnp.concatenate(
            [audio_sequences[:, i] for i in range(audio_sequences.shape[1])], axis=0)
        face = jnp.concatenate(
            [face_sequences[:, :, i] for i in range(face_sequences.shape[2])], axis=0)
    else:
        audio, face = audio_sequences, face_sequences

    # NCHW -> NHWC once; bf16 activations end-to-end.
    audio = jnp.transpose(audio, (0, 2, 3, 1)).astype(jnp.bfloat16)
    face = jnp.transpose(face, (0, 2, 3, 1)).astype(jnp.bfloat16)

    # audio encoder -> (B*T, 1, 1, 512)
    audio_embedding = _run_conv_seq(params["audio_enc"], AUDIO_ENCODER, audio)

    # mouth embedding (I3D stand-in), reshape/repeat exactly like the module
    mouth_feat = extract_mouth_features(params, mouths)          # (Bm, 1024)
    c_a = audio_embedding.shape[-1]
    mouth_embedding = mouth_feat.reshape(-1, c_a)[:, None, None, :]  # NHWC (.,1,1,512)
    rep_num = audio_embedding.shape[0] // mouth_embedding.shape[0]
    remainder = audio_embedding.shape[0] % mouth_embedding.shape[0]
    mouth_embedding = jnp.repeat(mouth_embedding, rep_num, axis=0)
    if remainder:  # guard: remainder==0 would otherwise double the batch
        mouth_embedding = jnp.concatenate(
            [mouth_embedding, mouth_embedding[-remainder:]], axis=0)

    # face encoder
    feats = []
    x = face
    for blk_params, blk_specs in zip(params["face_enc"], FACE_ENCODER):
        x = _run_conv_seq(blk_params, blk_specs, x)
        feats.append(x)

    x = jnp.concatenate([audio_embedding, mouth_embedding, feats[-1]], axis=-1)
    feats.pop()

    # face decoder
    for dec_params, (t_spec, conv_specs) in zip(params["face_dec"], FACE_DECODER):
        wt, bt = dec_params["up"]
        _, _, k, stride, pad, opad = t_spec
        x = conv_transpose2d_block(x, wt, bt, stride, pad, opad, act="relu")
        x = _run_conv_seq(dec_params["convs"], conv_specs, x)
        x = jnp.concatenate((x, feats[-1]), axis=-1)
        feats.pop()

    # output block: Conv2d(+BN+ReLU) -> nn.Conv2d(32,3,1) -> Sigmoid
    w1, b1 = params["out_conv"]
    x = conv2d_block(x, w1, b1, (1, 1), (1, 1), bn=True, residual=False, act="relu")
    w2, b2 = params["out_final"]
    x = conv2d_block(x, w2, b2, (1, 1), (0, 0), bn=False, residual=False,
                     act="sigmoid")

    x = jnp.transpose(x, (0, 3, 1, 2)).astype(jnp.float32)      # NHWC -> NCHW

    if input_dim_size > 4:
        xs = jnp.split(x, x.shape[0] // B, axis=0)   # T chunks of size B
        outputs = jnp.stack(xs, axis=2)              # (B, 3, T, H, W)
    else:
        outputs = x
    return outputs


# ----------------------------------------------------------------------------
if __name__ == "__main__":
    key = jax.random.PRNGKey(0)
    params = init_params(key)

    # Shapes dictated by the architecture: faces must be 96x96 so the encoder
    # bottleneck reaches 1x1 and the skip connections line up; audio mel 80x16.
    B, T = 1, 3
    k_a, k_f, k_m = jax.random.split(jax.random.fold_in(key, 999), 3)
    audio_sequences = jax.random.normal(k_a, (B, T, 1, 80, 16), jnp.float32)
    face_sequences = jax.random.normal(k_f, (B, 6, T, 96, 96), jnp.float32)
    mouths = jax.random.normal(k_m, (B, 2, 5, 32, 32), jnp.float32)

    out = flow_model_forward(params, audio_sequences, face_sequences, mouths)
    out = jax.block_until_ready(out)

    assert out.shape == (B, 3, T, 96, 96), out.shape
    assert bool(jnp.all(jnp.isfinite(out)))
    assert bool(jnp.all((out >= 0.0) & (out <= 1.0)))   # sigmoid output
    print("KERNEL_OK")
</pallas_src>

<mosaic_0001>
module attributes {stable_mosaic.version = 11 : i64} {
  func.func @_gemm_kernel_single(%arg0: i32, %arg1: i32, %arg2: memref<384x128xbf16, #tpu.memory_space<vmem>>, %arg3: memref<128x128xbf16, #tpu.memory_space<vmem>>, %arg4: memref<1x128xf32, #tpu.memory_space<vmem>>, %arg5: memref<1x128xf32, #tpu.memory_space<vmem>>, %arg6: memref<384x128xbf16, #tpu.memory_space<vmem>>) attributes {dimension_semantics = [#tpu.dimension_semantics<parallel>, #tpu.dimension_semantics<parallel>], iteration_bounds = array<i64: 10, 1>, scalar_prefetch = 0 : i64, scratch_operands = 0 : i64, tpu.core_type = #tpu.core_type<tc>, window_params = [{transform_indices = @transform_0, window_bounds = array<i64: 384, 128>}, {transform_indices = @transform_1, window_bounds = array<i64: 128, 128>}, {transform_indices = @transform_2, window_bounds = array<i64: 1, 128>}, {transform_indices = @transform_3, window_bounds = array<i64: 1, 128>}, {transform_indices = @transform_4, window_bounds = array<i64: 384, 128>}]} {
    %c0 = arith.constant 0 : index
    %c0_0 = arith.constant 0 : index
    %0 = vector.load %arg2[%c0, %c0_0] : memref<384x128xbf16, #tpu.memory_space<vmem>>, vector<384x128xbf16>
    %c0_1 = arith.constant 0 : index
    %c0_2 = arith.constant 0 : index
    %1 = vector.load %arg3[%c0_1, %c0_2] : memref<128x128xbf16, #tpu.memory_space<vmem>>, vector<128x128xbf16>
    %cst = arith.constant dense<0.000000e+00> : vector<384x128xf32>
    %2 = tpu.matmul %0, %1, %cst {dimension_numbers = #tpu.dot_dimension_numbers<[1], [0], [0], [1], [0, 0, 1, 1], [], []>} : vector<384x128xbf16>, vector<128x128xbf16>, vector<384x128xf32> -> vector<384x128xf32>
    %c0_3 = arith.constant 0 : index
    %c0_4 = arith.constant 0 : index
    %3 = vector.load %arg4[%c0_3, %c0_4] : memref<1x128xf32, #tpu.memory_space<vmem>>, vector<1x128xf32>
    %c0_5 = arith.constant 0 : index
    %c0_6 = arith.constant 0 : index
    %4 = vector.load %arg5[%c0_5, %c0_6] : memref<1x128xf32, #tpu.memory_space<vmem>>, vector<1x128xf32>
    %5 = vector.broadcast %3 : vector<1x128xf32> to vector<384x128xf32>
    %6 = arith.mulf %2, %5 : vector<384x128xf32>
    %7 = vector.broadcast %4 : vector<1x128xf32> to vector<384x128xf32>
    %8 = arith.addf %6, %7 : vector<384x128xf32>
    %cst_7 = arith.constant 0.000000e+00 : f32
    %9 = vector.broadcast %cst_7 : f32 to vector<384x128xf32>
    %10 = arith.maximumf %8, %9 : vector<384x128xf32>
    %11 = arith.truncf %10 : vector<384x128xf32> to vector<384x128xbf16>
    %c0_8 = arith.constant 0 : index
    %c0_9 = arith.constant 0 : index
    %12 = vector.load %arg6[%c0_8, %c0_9] : memref<384x128xbf16, #tpu.memory_space<vmem>>, vector<384x128xbf16>
    tpu.vector_store %arg6[%c0_8, %c0_9], %11 {strides = array<i32>} : memref<384x128xbf16, #tpu.memory_space<vmem>>, vector<384x128xbf16>,
    return
  }
  func.func @transform_0(%arg0: i32, %arg1: i32) -> (i32, i32) {
    %c0_i32 = arith.constant 0 : i32
    %c0_i32_0 = arith.constant 0 : i32
    return %arg0, %c0_i32 : i32, i32
  }
  func.func @transform_1(%arg0: i32, %arg1: i32) -> (i32, i32) {
    %c0_i32 = arith.constant 0 : i32
    %c0_i32_0 = arith.constant 0 : i32
    return %c0_i32, %arg1 : i32, i32
  }
  func.func @transform_2(%arg0: i32, %arg1: i32) -> (i32, i32) {
    %c0_i32 = arith.constant 0 : i32
    %c0_i32_0 = arith.constant 0 : i32
    return %c0_i32, %arg1 : i32, i32
  }
  func.func @transform_3(%arg0: i32, %arg1: i32) -> (i32, i32) {
    %c0_i32 = arith.constant 0 : i32
    %c0_i32_0 = arith.constant 0 : i32
    return %c0_i32, %arg1 : i32, i32
  }
  func.func @transform_4(%arg0: i32, %arg1: i32) -> (i32, i32) {
    %c0_i32 = arith.constant 0 : i32
    return %arg0, %arg1 : i32, i32
  }
}

</mosaic_0001>

<bundles_post_ra>
// kernel: _pallas_gemm.1
= control target key start
LH: loop header
LB: loop body
LE: loop exit
PB: predicated region body
PF: predicated region fallthrough
CT: control target
= control target key end

     0   :  { %s1762_s15 = smov 0   ;;  %s1764_s16 = smov 0   ;;  %s1984_s0 = inlined_call_operand.vmem [shape: bf16[3840,128], index: 0, kind: input, shape index: {}]   ;;  %s1985_s1 = inlined_call_operand.vmem [shape: bf16[128,128], index: 1, kind: input, shape index: {}]   ;;  %s1986_s2 = inlined_call_operand.vmem [shape: f32[1,128], index: 2, kind: input, shape index: {}]   ;;  %s1987_s3 = inlined_call_operand.vmem [shape: f32[1,128], index: 3, kind: input, shape index: {}]   ;;  %s1988_s4 = inlined_call_operand.vmem [shape: bf16[3840,128], index: 4, kind: output, shape index: {}]  }
   0x1   :  { %s1766_s17 = smov 0  }
   0x2 LB: > { %s26_s18 = sadd.s32 1, %s1731_s16  ;;  %p1267_p0 = scmp.ge.s32.totalorder %s1735_s17, 1  ;;  %s1735_s17 = sphi %s1766_s17, %s14_s17   ;;  %s1731_s16 = sphi %s1764_s16, %s1990_s16   ;;  %s1727_s15 = sphi %s1762_s15, %s1989_s15  }
   0x3   : > { %p28_p1 = scmp.ge.s32.totalorder %s26_s18, 10  ;;  %p202_p2 = scmp.lt.s32.totalorder %s1735_s17, 11 }
   0x5   : > { %s1992_s18 = smov (%p28_p1, %s26_s18), 0  ;;  %p203_p3 = pnand %p1267_p0, %p202_p2 }
   0x6   : > { %s241_s21 = smul.u32 (!%p203_p3), 48, %s1727_s15 }
   0x7   : > { %206 = sbr.rel (%p203_p3) target bundleno = 293 (0x125), region = 36 }
   0x8   : > { %p242_p4 = scmp.lt.s32.totalorder (!%p203_p3), %s241_s21, 479 }
   0xc   : > { %v1681_v0 = vld [vmem:[%s1985_s1 + $0x38] sm:$0xff]   ;;  %v1682_v1 = vld [vmem:[%s1985_s1 + $0x30] sm:$0xff]   ;;  %v1683_v2 = vld [vmem:[%s1985_s1 + $0x28] sm:$0xff]   ;;  %s1994_s21 = smov (!%p242_p4, %s241_s21), 479 }
   0xd   : > { %1577 = vmatprep.subr.bf16.mxu0 %v1681_v0  ;;  %1641 = vmatprep.subr.bf16.mxu1 %v1681_v0  ;;  %s1268_s26 = sshll.u32 %s1994_s21, 2  ;;  %v1684_v3 = vld [vmem:[%s1985_s1 + $0x20] sm:$0xff]   ;;  %v1685_v6 = vld [vmem:[%s1985_s1 + $0x18] sm:$0xff]   ;;  %v1686_v7 = vld [vmem:[%s1985_s1 + $0x10] sm:$0xff]  }
   0xe   : > { %1578 = vmatpush3.bf16.msra.mxu0 %v1681_v0  ;;  %1649 = vmatpush3.bf16.msra.mxu1 %v1681_v0  ;;  %s1800_s5 = scalar_lea.vmem %s1984_s0, %s1268_s26  ;;  %v1687_v8 = vld [vmem:[%s1985_s1 + $0x8] sm:$0xff]   ;;  %v1688_v9 = vld [vmem:[%s1985_s1] sm:$0xff]   ;;  %s1871_s24 = scalar_lea.vmem %s1988_s4, %s1268_s26 }
   0xf   : > { %1579 = vmatprep.subr.bf16.mxu0 %v1682_v1  ;;  %1642 = vmatprep.subr.bf16.mxu1 %v1682_v1  ;;  %v1689_v4 = vld [vmem:[%s1800_s5] sm:$0xff]   ;;  %v1691_v10 = vld [vmem:[%s1800_s5 + $0x8] sm:$0xff]   ;;  %v1693_v12 = vld [vmem:[%s1800_s5 + $0x10] sm:$0xff]  }
  0x10   : > { %v1690_v5 = vld [vmem:[%s1800_s5 + $0x60] sm:$0xff]   ;;  %1593 = vmatprep.mubr.bf16.mxu0 %v1689_v4  ;;  %v1692_v11 = vld [vmem:[%s1800_s5 + $0x68] sm:$0xff]   ;;  %v1694_v13 = vld [vmem:[%s1800_s5 + $0x70] sm:$0xff]  }
  0x11   : > { %1617 = vmatprep.mubr.bf16.mxu1 %v1690_v5  ;;  %v1695_v14 = vld [vmem:[%s1800_s5 + $0x18] sm:$0xff]   ;;  %v1697_v16 = vld [vmem:[%s1800_s5 + $0x20] sm:$0xff]   ;;  %v1699_v18 = vld [vmem:[%s1800_s5 + $0x28] sm:$0xff]  }
  0x12   : > { %1580 = vmatpush3.bf16.msra.mxu0 %v1682_v1  ;;  %1650 = vmatpush3.bf16.msra.mxu1 %v1682_v1  ;;  %v1696_v15 = vld [vmem:[%s1800_s5 + $0x78] sm:$0xff]   ;;  %v1698_v17 = vld [vmem:[%s1800_s5 + $0x80] sm:$0xff]   ;;  %v1700_v19 = vld [vmem:[%s1800_s5 + $0x88] sm:$0xff]  }
  0x13   : > { %1581 = vmatprep.subr.bf16.mxu0 %v1683_v2  ;;  %1643 = vmatprep.subr.bf16.mxu1 %v1683_v2  ;;  %v1701_v20 = vld [vmem:[%s1800_s5 + $0x30] sm:$0xff]   ;;  %v1703_v22 = vld [vmem:[%s1800_s5 + $0x38] sm:$0xff]   ;;  %v1705_v24 = vld [vmem:[%s1800_s5 + $0x40] sm:$0xff]  }
  0x14   : > { %v1702_v21 = vld [vmem:[%s1800_s5 + $0x90] sm:$0xff]   ;;  %v1704_v23 = vld [vmem:[%s1800_s5 + $0x98] sm:$0xff]   ;;  %v1706_v25 = vld [vmem:[%s1800_s5 + $0xa0] sm:$0xff]  }
  0x15   : > { %v1707_v26 = vld [vmem:[%s1800_s5 + $0x48] sm:$0xff]   ;;  %v1709_v28 = vld [vmem:[%s1800_s5 + $0x50] sm:$0xff]   ;;  %v1711_v30 = vld [vmem:[%s1800_s5 + $0x58] sm:$0xff]  }
  0x16   : > { %1582 = vmatpush3.bf16.msra.mxu0 %v1683_v2  ;;  %1651 = vmatpush3.bf16.msra.mxu1 %v1683_v2  ;;  %v1708_v27 = vld [vmem:[%s1800_s5 + $0xa8] sm:$0xff]   ;;  %v1710_v29 = vld [vmem:[%s1800_s5 + $0xb0] sm:$0xff]   ;;  %v1712_v31 = vld [vmem:[%s1800_s5 + $0xb8] sm:$0xff]  }
  0x17   : > { %1583 = vmatprep.subr.bf16.mxu0 %v1684_v3  ;;  %1644 = vmatprep.subr.bf16.mxu1 %v1684_v3  ;;  %v1841_v32 = vld [vmem:[%s1986_s2] ss:$0 sm:$0xff] }
  0x18   : > { %v1848_v37 = vld [vmem:[%s1987_s3] ss:$0 sm:$0xff] }
  0x1a   : > { %1584 = vmatpush3.bf16.msra.mxu0 %v1684_v3  ;;  %1652 = vmatpush3.bf16.msra.mxu1 %v1684_v3 }
  0x1b   : > { %1585 = vmatprep.subr.bf16.mxu0 %v1685_v6  ;;  %1645 = vmatprep.subr.bf16.mxu1 %v1685_v6 }
  0x1e   : > { %1586 = vmatpush3.bf16.msra.mxu0 %v1685_v6  ;;  %1653 = vmatpush3.bf16.msra.mxu1 %v1685_v6 }
  0x1f   : > { %1587 = vmatprep.subr.bf16.mxu0 %v1686_v7  ;;  %1646 = vmatprep.subr.bf16.mxu1 %v1686_v7 }
  0x22   : > { %1588 = vmatpush3.bf16.msra.mxu0 %v1686_v7  ;;  %1654 = vmatpush3.bf16.msra.mxu1 %v1686_v7 }
  0x23   : > { %1589 = vmatprep.subr.bf16.mxu0 %v1687_v8  ;;  %1647 = vmatprep.subr.bf16.mxu1 %v1687_v8 }
  0x26   : > { %1590 = vmatpush3.bf16.msra.mxu0 %v1687_v8  ;;  %1655 = vmatpush3.bf16.msra.mxu1 %v1687_v8 }
  0x27   : > { %1591 = vmatprep.subr.bf16.mxu0 %v1688_v9  ;;  %1648 = vmatprep.subr.bf16.mxu1 %v1688_v9 }
  0x2a   : > { %1592 = vmatpush3.bf16.msra.mxu0 %v1688_v9  ;;  %1656 = vmatpush3.bf16.msra.mxu1 %v1688_v9 }
  0x2d   : > { %1594 = vmatmul.mubr.bf16.vlgmr.msra.gmra.mxu0 %v1691_v10  ;;  %1618 = vmatmul.mubr.bf16.vlgmr.msra.gmra.mxu1 %v1692_v11 }
  0x2e   : > { %1597 = vmatprep.mubr.bf16.mxu0 %v1693_v12  ;;  %1621 = vmatprep.mubr.bf16.mxu1 %v1694_v13 }
  0x35   : > { %1598 = vmatmul.mubr.bf16.gmra.mxu0 %v1695_v14  ;;  %1622 = vmatmul.mubr.bf16.gmra.mxu1 %v1696_v15 }
  0x36   : > { %1601 = vmatprep.mubr.bf16.mxu0 %v1697_v16  ;;  %1625 = vmatprep.mubr.bf16.mxu1 %v1698_v17 }
  0x3d   : > { %1602 = vmatmul.mubr.bf16.gmra.mxu0 %v1699_v18  ;;  %1626 = vmatmul.mubr.bf16.gmra.mxu1 %v1700_v19 }
  0x3e   : > { %1605 = vmatprep.mubr.bf16.mxu0 %v1701_v20  ;;  %1629 = vmatprep.mubr.bf16.mxu1 %v1702_v21 }
  0x45   : > { %1606 = vmatmul.mubr.bf16.gmra.mxu0 %v1703_v22  ;;  %1630 = vmatmul.mubr.bf16.gmra.mxu1 %v1704_v23 }
  0x46   : > { %1609 = vmatprep.mubr.bf16.mxu0 %v1705_v24  ;;  %1633 = vmatprep.mubr.bf16.mxu1 %v1706_v25 }
  0x4d   : > { %1610 = vmatmul.mubr.bf16.gmra.mxu0 %v1707_v26  ;;  %1634 = vmatmul.mubr.bf16.gmra.mxu1 %v1708_v27 }
  0x4e   : > { %1613 = vmatprep.mubr.bf16.mxu0 %v1709_v28  ;;  %1637 = vmatprep.mubr.bf16.mxu1 %v1710_v29 }
  0x55   : > { %1614 = vmatmul.mubr.bf16.gmra.mxu0 %v1711_v30  ;;  %1638 = vmatmul.mubr.bf16.gmra.mxu1 %v1712_v31 }
  0xed   : > { %v1595_v33 = vpop.f32.mrf.mxu0  ;;  %v1619_v34 = vpop.f32.mrf.mxu1 }
  0xee   : > { %v758_v35 = vmul.f32 %v1595_v33, %v1841_v32  ;;  %v782_v36 = vmul.f32 %v1619_v34, %v1841_v32 }
  0xef   : > { %v557_v38 = vpop.f32.mrf.mxu0  ;;  %v653_v39 = vpop.f32.mrf.mxu1 }
  0xf0   : > { %v756_v40 = vmul.f32 %v1841_v32, %v557_v38  ;;  %v780_v41 = vmul.f32 %v1841_v32, %v653_v39  ;;  %v812_v44 = vadd.f32 %v1848_v37, %v758_v35  ;;  %v836_v45 = vadd.f32 %v1848_v37, %v782_v36 }
  0xf1   : > { %v1596_v42 = vpop.f32.mrf.mxu0  ;;  %v1620_v43 = vpop.f32.mrf.mxu1 }
  0xf2   : > { %v759_v46 = vmul.f32 %v1596_v42, %v1841_v32  ;;  %v783_v47 = vmul.f32 %v1620_v43, %v1841_v32  ;;  %v810_v50 = vadd.f32 %v1848_v37, %v756_v40  ;;  %v834_v51 = vadd.f32 %v1848_v37, %v780_v41 }
  0xf3   : > { %v560_v48 = vpop.f32.mrf.mxu0  ;;  %v656_v49 = vpop.f32.mrf.mxu1  ;;  %v860_v58 = vmax.f32 %v812_v44, 0.0  ;;  %v884_v59 = vmax.f32 %v836_v45, 0.0 }
  0xf4   : > { %v757_v52 = vmul.f32 %v1841_v32, %v560_v48  ;;  %v781_v53 = vmul.f32 %v1841_v32, %v656_v49  ;;  %v813_v54 = vadd.f32 %v1848_v37, %v759_v46  ;;  %v837_v55 = vadd.f32 %v1848_v37, %v783_v47 }
  0xf5   : > { %v1599_v56 = vpop.f32.mrf.mxu0  ;;  %v1623_v57 = vpop.f32.mrf.mxu1  ;;  %v858_v4 = vmax.f32 %v810_v50, 0.0  ;;  %v882_v5 = vmax.f32 %v834_v51, 0.0 }
  0xf6   : > { %v811_v60 = vadd.f32 %v1848_v37, %v757_v52  ;;  %v835_v61 = vadd.f32 %v1848_v37, %v781_v53  ;;  %v861_v62 = vmax.f32 %v813_v54, 0.0  ;;  %v885_v63 = vmax.f32 %v837_v55, 0.0 }
  0xf7   : > { %v762_v0 = vmul.f32 %v1599_v56, %v1841_v32  ;;  %v786_v1 = vmul.f32 %v1623_v57, %v1841_v32  ;;  %v573_v2 = vpop.f32.mrf.mxu0  ;;  %v669_v3 = vpop.f32.mrf.mxu1 }
  0xf8   : > { %v859_v6 = vmax.f32 %v811_v60, 0.0  ;;  %v883_v7 = vmax.f32 %v835_v61, 0.0  ;;  %v1410_v8 = vpack.c.bf16 %v861_v62, %v860_v58  ;;  %v1470_v9 = vpack.c.bf16 %v885_v63, %v884_v59 }
  0xf9   : > { %v760_v10 = vmul.f32 %v1841_v32, %v573_v2  ;;  %v784_v11 = vmul.f32 %v1841_v32, %v669_v3  ;;  %v1600_v12 = vpop.f32.mrf.mxu0  ;;  %v1624_v13 = vpop.f32.mrf.mxu1  ;;  %v816_v16 = vadd.f32 %v1848_v37, %v762_v0  ;;  %v840_v17 = vadd.f32 %v1848_v37, %v786_v1 }
  0xfa   : > { %v1405_v14 = vpack.c.bf16 %v859_v6, %v858_v4  ;;  %v1465_v15 = vpack.c.bf16 %v883_v7, %v882_v5  ;;  %1522 = vst [vmem:[%s1871_s24 + $0x8] sm:$0xff] %v1410_v8   ;;  %1534 = vst [vmem:[%s1871_s24 + $0x68] sm:$0xff] %v1470_v9   ;;  %v763_v18 = vmul.f32 %v1600_v12, %v1841_v32 }
  0xfb   : > { %v787_v19 = vmul.f32 %v1624_v13, %v1841_v32  ;;  %v576_v20 = vpop.f32.mrf.mxu0  ;;  %v672_v21 = vpop.f32.mrf.mxu1  ;;  %v814_v22 = vadd.f32 %v1848_v37, %v760_v10  ;;  %v838_v23 = vadd.f32 %v1848_v37, %v784_v11  ;;  %v864_v35 = vmax.f32 %v816_v16, 0.0 }
  0xfc   : > { %1406 = vst [vmem:[%s1871_s24] sm:$0xff] %v1405_v14   ;;  %1533 = vst [vmem:[%s1871_s24 + $0x60] sm:$0xff] %v1465_v15   ;;  %v761_v24 = vmul.f32 %v1841_v32, %v576_v20  ;;  %v785_v25 = vmul.f32 %v1841_v32, %v672_v21  ;;  %v817_v26 = vadd.f32 %v1848_v37, %v763_v18  ;;  %v888_v36 = vmax.f32 %v840_v17, 0.0 }
  0xfd   : > { %v841_v27 = vadd.f32 %v1848_v37, %v787_v19  ;;  %v1603_v28 = vpop.f32.mrf.mxu0  ;;  %v1627_v29 = vpop.f32.mrf.mxu1  ;;  %v862_v42 = vmax.f32 %v814_v22, 0.0  ;;  %v886_v43 = vmax.f32 %v838_v23, 0.0 }
  0xfe   : > { %v815_v30 = vadd.f32 %v1848_v37, %v761_v24  ;;  %v839_v31 = vadd.f32 %v1848_v37, %v785_v25  ;;  %v766_v33 = vmul.f32 %v1603_v28, %v1841_v32  ;;  %v790_v34 = vmul.f32 %v1627_v29, %v1841_v32 }
  0xff   : > { %v865_v38 = vmax.f32 %v817_v26, 0.0  ;;  %v889_v39 = vmax.f32 %v841_v27, 0.0  ;;  %v589_v40 = vpop.f32.mrf.mxu0  ;;  %v685_v41 = vpop.f32.mrf.mxu1 }
 0x100   : > { %v863_v44 = vmax.f32 %v815_v30, 0.0  ;;  %v887_v45 = vmax.f32 %v839_v31, 0.0  ;;  %v764_v48 = vmul.f32 %v1841_v32, %v589_v40  ;;  %v788_v49 = vmul.f32 %v1841_v32, %v685_v41 }
 0x101   : > { %v1420_v46 = vpack.c.bf16 %v865_v38, %v864_v35  ;;  %v1480_v47 = vpack.c.bf16 %v889_v39, %v888_v36  ;;  %v1604_v50 = vpop.f32.mrf.mxu0  ;;  %v1628_v51 = vpop.f32.mrf.mxu1  ;;  %v820_v54 = vadd.f32 %v1848_v37, %v766_v33  ;;  %v844_v55 = vadd.f32 %v1848_v37, %v790_v34 }
 0x102   : > { %v1415_v52 = vpack.c.bf16 %v863_v44, %v862_v42  ;;  %v1475_v53 = vpack.c.bf16 %v887_v45, %v886_v43  ;;  %v767_v56 = vmul.f32 %v1604_v50, %v1841_v32  ;;  %v791_v57 = vmul.f32 %v1628_v51, %v1841_v32 }
 0x103   : > { %1524 = vst [vmem:[%s1871_s24 + $0x18] sm:$0xff] %v1420_v46   ;;  %1536 = vst [vmem:[%s1871_s24 + $0x78] sm:$0xff] %v1480_v47   ;;  %v592_v58 = vpop.f32.mrf.mxu0  ;;  %v688_v59 = vpop.f32.mrf.mxu1  ;;  %v818_v60 = vadd.f32 %v1848_v37, %v764_v48  ;;  %v842_v61 = vadd.f32 %v1848_v37, %v788_v49  ;;  %v868_v4 = vmax.f32 %v820_v54, 0.0  ;;  %v892_v5 = vmax.f32 %v844_v55, 0.0 }
 0x104   : > { %1523 = vst [vmem:[%s1871_s24 + $0x10] sm:$0xff] %v1415_v52   ;;  %1535 = vst [vmem:[%s1871_s24 + $0x70] sm:$0xff] %v1475_v53   ;;  %v765_v62 = vmul.f32 %v1841_v32, %v592_v58  ;;  %v789_v63 = vmul.f32 %v1841_v32, %v688_v59  ;;  %v821_v0 = vadd.f32 %v1848_v37, %v767_v56 }
 0x105   : > { %v845_v1 = vadd.f32 %v1848_v37, %v791_v57  ;;  %v1607_v2 = vpop.f32.mrf.mxu0  ;;  %v1631_v3 = vpop.f32.mrf.mxu1  ;;  %v866_v14 = vmax.f32 %v818_v60, 0.0  ;;  %v890_v15 = vmax.f32 %v842_v61, 0.0 }
 0x106   : > { %v819_v6 = vadd.f32 %v1848_v37, %v765_v62  ;;  %v843_v7 = vadd.f32 %v1848_v37, %v789_v63  ;;  %v869_v8 = vmax.f32 %v821_v0, 0.0  ;;  %v770_v10 = vmul.f32 %v1607_v2, %v1841_v32 }
 0x107   : > { %v893_v9 = vmax.f32 %v845_v1, 0.0  ;;  %v794_v11 = vmul.f32 %v1631_v3, %v1841_v32  ;;  %v605_v12 = vpop.f32.mrf.mxu0  ;;  %v701_v13 = vpop.f32.mrf.mxu1 }
 0x108   : > { %v867_v16 = vmax.f32 %v819_v6, 0.0  ;;  %v891_v17 = vmax.f32 %v843_v7, 0.0  ;;  %v1430_v18 = vpack.c.bf16 %v869_v8, %v868_v4  ;;  %v768_v20 = vmul.f32 %v1841_v32, %v605_v12 }
 0x109   : > { %v1490_v19 = vpack.c.bf16 %v893_v9, %v892_v5  ;;  %v792_v21 = vmul.f32 %v1841_v32, %v701_v13  ;;  %v1608_v22 = vpop.f32.mrf.mxu0  ;;  %v1632_v23 = vpop.f32.mrf.mxu1  ;;  %v824_v26 = vadd.f32 %v1848_v37, %v770_v10  ;;  %v848_v27 = vadd.f32 %v1848_v37, %v794_v11 }
 0x10a   : > { %v1425_v24 = vpack.c.bf16 %v867_v16, %v866_v14  ;;  %v1485_v25 = vpack.c.bf16 %v891_v17, %v890_v15  ;;  %1526 = vst [vmem:[%s1871_s24 + $0x28] sm:$0xff] %v1430_v18   ;;  %v771_v28 = vmul.f32 %v1608_v22, %v1841_v32  ;;  %v795_v29 = vmul.f32 %v1632_v23, %v1841_v32 }
 0x10b   : > { %1538 = vst [vmem:[%s1871_s24 + $0x88] sm:$0xff] %v1490_v19   ;;  %v608_v30 = vpop.f32.mrf.mxu0  ;;  %v704_v31 = vpop.f32.mrf.mxu1  ;;  %v822_v33 = vadd.f32 %v1848_v37, %v768_v20  ;;  %v846_v34 = vadd.f32 %v1848_v37, %v792_v21  ;;  %v872_v46 = vmax.f32 %v824_v26, 0.0  ;;  %v896_v47 = vmax.f32 %v848_v27, 0.0 }
 0x10c   : > { %1525 = vst [vmem:[%s1871_s24 + $0x20] sm:$0xff] %v1425_v24   ;;  %1537 = vst [vmem:[%s1871_s24 + $0x80] sm:$0xff] %v1485_v25   ;;  %v769_v35 = vmul.f32 %v1841_v32, %v608_v30  ;;  %v793_v36 = vmul.f32 %v1841_v32, %v704_v31  ;;  %v825_v38 = vadd.f32 %v1848_v37, %v771_v28 }
 0x10d   : > { %v849_v39 = vadd.f32 %v1848_v37, %v795_v29  ;;  %v1611_v40 = vpop.f32.mrf.mxu0  ;;  %v1635_v41 = vpop.f32.mrf.mxu1  ;;  %v870_v52 = vmax.f32 %v822_v33, 0.0  ;;  %v894_v53 = vmax.f32 %v846_v34, 0.0 }
 0x10e   : > { %v823_v42 = vadd.f32 %v1848_v37, %v769_v35  ;;  %v847_v43 = vadd.f32 %v1848_v37, %v793_v36  ;;  %v774_v44 = vmul.f32 %v1611_v40, %v1841_v32  ;;  %v798_v45 = vmul.f32 %v1635_v41, %v1841_v32 }
 0x10f   : > { %v873_v48 = vmax.f32 %v825_v38, 0.0  ;;  %v897_v49 = vmax.f32 %v849_v39, 0.0  ;;  %v621_v50 = vpop.f32.mrf.mxu0  ;;  %v717_v51 = vpop.f32.mrf.mxu1 }
 0x110   : > { %v871_v54 = vmax.f32 %v823_v42, 0.0  ;;  %v895_v55 = vmax.f32 %v847_v43, 0.0  ;;  %v772_v58 = vmul.f32 %v1841_v32, %v621_v50  ;;  %v796_v59 = vmul.f32 %v1841_v32, %v717_v51 }
 0x111   : > { %v1440_v56 = vpack.c.bf16 %v873_v48, %v872_v46  ;;  %v1500_v57 = vpack.c.bf16 %v897_v49, %v896_v47  ;;  %v1612_v60 = vpop.f32.mrf.mxu0  ;;  %v1636_v61 = vpop.f32.mrf.mxu1  ;;  %v828_v0 = vadd.f32 %v1848_v37, %v774_v44  ;;  %v852_v1 = vadd.f32 %v1848_v37, %v798_v45 }
 0x112   : > { %v1435_v62 = vpack.c.bf16 %v871_v54, %v870_v52  ;;  %v1495_v63 = vpack.c.bf16 %v895_v55, %v894_v53  ;;  %v775_v2 = vmul.f32 %v1612_v60, %v1841_v32  ;;  %v799_v3 = vmul.f32 %v1636_v61, %v1841_v32 }
 0x113   : > { %1528 = vst [vmem:[%s1871_s24 + $0x38] sm:$0xff] %v1440_v56   ;;  %1540 = vst [vmem:[%s1871_s24 + $0x98] sm:$0xff] %v1500_v57   ;;  %v624_v4 = vpop.f32.mrf.mxu0  ;;  %v720_v5 = vpop.f32.mrf.mxu1  ;;  %v826_v6 = vadd.f32 %v1848_v37, %v772_v58  ;;  %v850_v7 = vadd.f32 %v1848_v37, %v796_v59  ;;  %v876_v14 = vmax.f32 %v828_v0, 0.0  ;;  %v900_v15 = vmax.f32 %v852_v1, 0.0 }
 0x114   : > { %1527 = vst [vmem:[%s1871_s24 + $0x30] sm:$0xff] %v1435_v62   ;;  %1539 = vst [vmem:[%s1871_s24 + $0x90] sm:$0xff] %v1495_v63   ;;  %v773_v8 = vmul.f32 %v1841_v32, %v624_v4  ;;  %v797_v9 = vmul.f32 %v1841_v32, %v720_v5  ;;  %v829_v10 = vadd.f32 %v1848_v37, %v775_v2 }
 0x115   : > { %v853_v11 = vadd.f32 %v1848_v37, %v799_v3  ;;  %v1615_v12 = vpop.f32.mrf.mxu0  ;;  %v1639_v13 = vpop.f32.mrf.mxu1  ;;  %v874_v24 = vmax.f32 %v826_v6, 0.0  ;;  %v898_v25 = vmax.f32 %v850_v7, 0.0 }
 0x116   : > { %v827_v16 = vadd.f32 %v1848_v37, %v773_v8  ;;  %v851_v17 = vadd.f32 %v1848_v37, %v797_v9  ;;  %v877_v18 = vmax.f32 %v829_v10, 0.0  ;;  %v778_v20 = vmul.f32 %v1615_v12, %v1841_v32 }
 0x117   : > { %v901_v19 = vmax.f32 %v853_v11, 0.0  ;;  %v802_v21 = vmul.f32 %v1639_v13, %v1841_v32  ;;  %v637_v22 = vpop.f32.mrf.mxu0  ;;  %v733_v23 = vpop.f32.mrf.mxu1 }
 0x118   : > { %v875_v26 = vmax.f32 %v827_v16, 0.0  ;;  %v899_v27 = vmax.f32 %v851_v17, 0.0  ;;  %v1450_v28 = vpack.c.bf16 %v877_v18, %v876_v14  ;;  %v776_v30 = vmul.f32 %v1841_v32, %v637_v22 }
 0x119   : > { %v1510_v29 = vpack.c.bf16 %v901_v19, %v900_v15  ;;  %v800_v31 = vmul.f32 %v1841_v32, %v733_v23  ;;  %v1616_v33 = vpop.f32.mrf.mxu0  ;;  %v1640_v34 = vpop.f32.mrf.mxu1  ;;  %v832_v38 = vadd.f32 %v1848_v37, %v778_v20  ;;  %v856_v39 = vadd.f32 %v1848_v37, %v802_v21 }
 0x11a   : > { %v1445_v35 = vpack.c.bf16 %v875_v26, %v874_v24  ;;  %v1505_v36 = vpack.c.bf16 %v899_v27, %v898_v25  ;;  %1530 = vst [vmem:[%s1871_s24 + $0x48] sm:$0xff] %v1450_v28   ;;  %v779_v40 = vmul.f32 %v1616_v33, %v1841_v32  ;;  %v803_v41 = vmul.f32 %v1640_v34, %v1841_v32 }
 0x11b   : > { %1542 = vst [vmem:[%s1871_s24 + $0xa8] sm:$0xff] %v1510_v29   ;;  %v640_v42 = vpop.f32.mrf.mxu0  ;;  %v736_v43 = vpop.f32.mrf.mxu1  ;;  %v830_v44 = vadd.f32 %v1848_v37, %v776_v30  ;;  %v854_v45 = vadd.f32 %v1848_v37, %v800_v31  ;;  %v880_v52 = vmax.f32 %v832_v38, 0.0  ;;  %v904_v53 = vmax.f32 %v856_v39, 0.0 }
 0x11c   : > { %1529 = vst [vmem:[%s1871_s24 + $0x40] sm:$0xff] %v1445_v35   ;;  %1541 = vst [vmem:[%s1871_s24 + $0xa0] sm:$0xff] %v1505_v36   ;;  %v777_v46 = vmul.f32 %v1841_v32, %v640_v42  ;;  %v801_v47 = vmul.f32 %v1841_v32, %v736_v43  ;;  %v833_v48 = vadd.f32 %v1848_v37, %v779_v40 }
 0x11d   : > { %v857_v49 = vadd.f32 %v1848_v37, %v803_v41  ;;  %v878_v56 = vmax.f32 %v830_v44, 0.0  ;;  %v902_v57 = vmax.f32 %v854_v45, 0.0 }
 0x11e   : > { %v831_v50 = vadd.f32 %v1848_v37, %v777_v46  ;;  %v855_v51 = vadd.f32 %v1848_v37, %v801_v47  ;;  %v881_v54 = vmax.f32 %v833_v48, 0.0 }
 0x11f   : > { %v905_v55 = vmax.f32 %v857_v49, 0.0 }
 0x120   : > { %v879_v58 = vmax.f32 %v831_v50, 0.0  ;;  %v903_v32 = vmax.f32 %v855_v51, 0.0  ;;  %v1460_v59 = vpack.c.bf16 %v881_v54, %v880_v52 }
 0x121   : > { %v1520_v60 = vpack.c.bf16 %v905_v55, %v904_v53 }
 0x122   : > { %v1455_v61 = vpack.c.bf16 %v879_v58, %v878_v56  ;;  %v1515_v62 = vpack.c.bf16 %v903_v32, %v902_v57  ;;  %1532 = vst [vmem:[%s1871_s24 + $0x58] sm:$0xff] %v1460_v59  }
 0x123   : > { %1544 = vst [vmem:[%s1871_s24 + $0xb8] sm:$0xff] %v1520_v60  }
 0x124   : > { %1531 = vst [vmem:[%s1871_s24 + $0x50] sm:$0xff] %v1455_v61   ;;  %1543 = vst [vmem:[%s1871_s24 + $0xb0] sm:$0xff] %v1515_v62  }
 0x125 PF: > { %s14_s17 = sadd.s32 1, %s1735_s17   ;;  %s1989_s15 = smov %s1731_s16 }
 0x126   : > { %p11_p5 = scmp.ge.s32.totalorder %s14_s17, 12   ;;  %s1990_s16 = smov %s1992_s18 }
 0x128   :  { %13 = sbr.rel (!%p11_p5) target bundleno = 2 (0x2), region = 75 }

</bundles_post_ra>
